<compile_context>
chip_gen: v6e
topology: v6e:2x2x1
jax: 0.10.0
libtpu: 0.0.40
codegen_flags: <defaults>
</compile_context>

<pallas_src>
import jax
import jax.numpy as jnp
from jax.experimental import pallas as pl
from jax.experimental.pallas import tpu as pltpu


LANE_TILE = 128  # lane-dense tile along the (padded) object axis


def _kl_center_kernel(ori_ref, proj_ref, valid_ref, out_ref):
    """Channel-softmax KL at gathered object centers, masked by validity.

    ori_ref / proj_ref : (B, C, T) VMEM tiles (T object-center columns on lanes)
    valid_ref          : (B, T)    1.0 for real objects, 0.0 for padding
    out_ref            : (B, T)    valid * KL( softmax_c(ori) || softmax_c(proj) )
    """
    o = ori_ref[...].astype(jnp.float32)   # (B, C, T)
    q = proj_ref[...].astype(jnp.float32)  # (B, C, T)

    # Numerically stable softmax statistics over the channel (sublane) axis.
    o_sh = o - jnp.max(o, axis=1, keepdims=True)
    q_sh = q - jnp.max(q, axis=1, keepdims=True)
    e_o = jnp.exp(o_sh)                              # (B, C, T)
    z_o = jnp.sum(e_o, axis=1)                       # (B, T)
    z_q = jnp.sum(jnp.exp(q_sh), axis=1)             # (B, T)

    # KL(P||Q) = (1/Z_o) * sum_c e_o * (o_sh - q_sh) + log Z_q - log Z_o
    # (avoids materializing log-softmaxes and a third full-tensor exp).
    s = jnp.sum(e_o * (o_sh - q_sh), axis=1)         # (B, T)
    kl = s * pl.reciprocal(z_o, approx=True) + jnp.log(z_q) - jnp.log(z_o)

    out_ref[...] = kl * valid_ref[...]


def _center_kl(ori_c, proj_c, valid, tile=LANE_TILE):
    """ori_c/proj_c: (B, C, Kp), valid: (B, Kp) -> masked per-object KL (B, Kp)."""
    B, C, Kp = ori_c.shape
    assert Kp % tile == 0  # wrapper pads the object axis, so this always holds
    grid = (Kp // tile,)

    cost = pl.CostEstimate(
        flops=10 * B * C * Kp,
        transcendentals=2 * B * C * Kp + 3 * B * Kp,
        bytes_accessed=(2 * B * C * Kp + 2 * B * Kp) * 4,
    )

    return pl.pallas_call(
        _kl_center_kernel,
        out_shape=jax.ShapeDtypeStruct((B, Kp), jnp.float32),
        grid_spec=pltpu.PrefetchScalarGridSpec(
            num_scalar_prefetch=0,
            grid=grid,
            in_specs=[
                pl.BlockSpec((B, C, tile), lambda t: (0, 0, t)),
                pl.BlockSpec((B, C, tile), lambda t: (0, 0, t)),
                pl.BlockSpec((B, tile), lambda t: (0, t)),
            ],
            out_specs=pl.BlockSpec((B, tile), lambda t: (0, t)),
        ),
        compiler_params=pltpu.CompilerParams(
            dimension_semantics=("parallel",),
        ),
        cost_estimate=cost,
    )(ori_c, proj_c, valid)


def kl_loss(ori_feats, projected_feats, hms, whs, inds, factor):
    """JAX/Pallas equivalent of the rrnet kl_loss forward.

    ori_feats, projected_feats : (B, C, H, W)  float
    hms                        : (B, Ch, H, W) float   (unused, see TODO above)
    whs                        : (B, K, 2)     float   (zero wh => padded obj)
    inds                       : (B, K)        int32   flattened H*W indices
    """
    B, C, H, W = ori_feats.shape
    HW = H * W
    K = inds.shape[1]

    ori = ori_feats.reshape(B, C, HW)
    proj = projected_feats.reshape(B, C, HW)

    # Gather the K object-center columns first (the loss only touches these).
    idx = jnp.broadcast_to(inds.astype(jnp.int32)[:, None, :], (B, C, K))
    ori_c = jnp.take_along_axis(ori, idx, axis=2)     # (B, C, K)
    proj_c = jnp.take_along_axis(proj, idx, axis=2)   # (B, C, K)

    valid = (jnp.sum(jnp.abs(whs), axis=-1) > 0).astype(jnp.float32)  # (B, K)

    # Pad the object axis to a lane-dense multiple of 128 (padding is masked).
    Kp = ((K + LANE_TILE - 1) // LANE_TILE) * LANE_TILE
    pad = Kp - K
    if pad:
        ori_c = jnp.pad(ori_c, ((0, 0), (0, 0), (0, pad)))
        proj_c = jnp.pad(proj_c, ((0, 0), (0, 0), (0, pad)))
        valid = jnp.pad(valid, ((0, 0), (0, pad)))

    masked_kl = _center_kl(ori_c, proj_c, valid)      # (B, Kp), zeros at padding
    loss = jnp.sum(masked_kl) / (jnp.sum(valid) + 1e-4)
    return loss * factor


class KLLoss:
    """Mirror of the PyTorch nn.Module (no learnable parameters)."""

    def __init__(self, factor):
        self.factor = factor

    def __call__(self, ori_feats, projected_feats, hms, whs, inds):
        return kl_loss(ori_feats, projected_feats, hms, whs, inds, self.factor)


def _reference_loss(ori, proj, whs, inds, factor):
    """Pure-JAX reference (full-map softmax-KL then gather) for validation."""
    Bv, Cv, Hv, Wv = ori.shape
    o = ori.reshape(Bv, Cv, Hv * Wv)
    q = proj.reshape(Bv, Cv, Hv * Wv)
    p_log = jax.nn.log_softmax(o, axis=1)
    q_log = jax.nn.log_softmax(q, axis=1)
    kl = jnp.sum(jnp.exp(p_log) * (p_log - q_log), axis=1)   # (B, HW)
    g = jnp.take_along_axis(kl, inds.astype(jnp.int32), axis=1)
    v = (jnp.sum(jnp.abs(whs), axis=-1) > 0).astype(jnp.float32)
    return jnp.sum(g * v) / (jnp.sum(v) + 1e-4) * factor


if __name__ == "__main__":
    key = jax.random.PRNGKey(0)
    k1, k2, k3, k4, k5 = jax.random.split(key, 5)

    B, C, H, W = 2, 4, 16, 16
    K = 8  # max objects per image

    ori_feats = jax.random.normal(k1, (B, C, H, W), dtype=jnp.float32)
    projected_feats = jax.random.normal(k2, (B, C, H, W), dtype=jnp.float32)
    hms = jax.nn.sigmoid(jax.random.normal(k3, (B, C, H, W), dtype=jnp.float32))
    whs = jnp.abs(jax.random.normal(k4, (B, K, 2), dtype=jnp.float32))
    # mark last two objects of each image as padding (zero wh)
    whs = whs.at[:, -2:, :].set(0.0)
    inds = jax.random.randint(k5, (B, K), 0, H * W, dtype=jnp.int32)

    loss_mod = KLLoss(factor=0.1)
    out = jax.jit(loss_mod.__call__)(ori_feats, projected_feats, hms, whs, inds)
    out = jax.block_until_ready(out)

    expected = _reference_loss(ori_feats, projected_feats, whs, inds, 0.1)

    assert out.shape == () and jnp.isfinite(out), out
    assert jnp.allclose(out, expected, rtol=1e-2, atol=1e-5), (out, expected)
    print("KERNEL_OK")
</pallas_src>

<mosaic_0001>
module attributes {stable_mosaic.version = 11 : i64} {
  func.func @_kl_center_kernel(%arg0: i32, %arg1: memref<2x4x128xf32, #tpu.memory_space<vmem>>, %arg2: memref<2x4x128xf32, #tpu.memory_space<vmem>>, %arg3: memref<2x128xf32, #tpu.memory_space<vmem>>, %arg4: memref<2x128xf32, #tpu.memory_space<vmem>>) attributes {dimension_semantics = [#tpu.dimension_semantics<parallel>], iteration_bounds = array<i64: 1>, scalar_prefetch = 0 : i64, scratch_operands = 0 : i64, tpu.core_type = #tpu.core_type<tc>, window_params = [{transform_indices = @transform_0, window_bounds = array<i64: 2, 4, 128>}, {transform_indices = @transform_1, window_bounds = array<i64: 2, 4, 128>}, {transform_indices = @transform_2, window_bounds = array<i64: 2, 128>}, {transform_indices = @transform_3, window_bounds = array<i64: 2, 128>}]} {
    %c0 = arith.constant 0 : index
    %c0_0 = arith.constant 0 : index
    %c0_1 = arith.constant 0 : index
    %0 = vector.load %arg1[%c0, %c0_0, %c0_1] : memref<2x4x128xf32, #tpu.memory_space<vmem>>, vector<2x4x128xf32>
    %c0_2 = arith.constant 0 : index
    %c0_3 = arith.constant 0 : index
    %c0_4 = arith.constant 0 : index
    %1 = vector.load %arg2[%c0_2, %c0_3, %c0_4] : memref<2x4x128xf32, #tpu.memory_space<vmem>>, vector<2x4x128xf32>
    %cst = arith.constant dense<0xFF800000> : vector<2x128xf32>
    %2 = vector.multi_reduction <maximumf>, %0, %cst [1] : vector<2x4x128xf32> to vector<2x128xf32>
    %3 = vector.shape_cast %2 : vector<2x128xf32> to vector<2x1x128xf32>
    %4 = vector.broadcast %3 : vector<2x1x128xf32> to vector<2x4x128xf32>
    %5 = arith.subf %0, %4 : vector<2x4x128xf32>
    %cst_5 = arith.constant dense<0xFF800000> : vector<2x128xf32>
    %6 = vector.multi_reduction <maximumf>, %1, %cst_5 [1] : vector<2x4x128xf32> to vector<2x128xf32>
    %7 = vector.shape_cast %6 : vector<2x128xf32> to vector<2x1x128xf32>
    %8 = vector.broadcast %7 : vector<2x1x128xf32> to vector<2x4x128xf32>
    %9 = arith.subf %1, %8 : vector<2x4x128xf32>
    %10 = math.exp %5 : vector<2x4x128xf32>
    %cst_6 = arith.constant dense<0.000000e+00> : vector<2x128xf32>
    %11 = vector.multi_reduction <add>, %10, %cst_6 [1] : vector<2x4x128xf32> to vector<2x128xf32>
    %12 = math.exp %9 : vector<2x4x128xf32>
    %cst_7 = arith.constant dense<0.000000e+00> : vector<2x128xf32>
    %13 = vector.multi_reduction <add>, %12, %cst_7 [1] : vector<2x4x128xf32> to vector<2x128xf32>
    %14 = arith.subf %5, %9 : vector<2x4x128xf32>
    %15 = arith.mulf %10, %14 : vector<2x4x128xf32>
    %cst_8 = arith.constant dense<0.000000e+00> : vector<2x128xf32>
    %16 = vector.multi_reduction <add>, %15, %cst_8 [1] : vector<2x4x128xf32> to vector<2x128xf32>
    %17 = tpu.reciprocal %11 {approx = true} : vector<2x128xf32> -> vector<2x128xf32>
    %18 = arith.mulf %16, %17 : vector<2x128xf32>
    %19 = math.log %13 : vector<2x128xf32>
    %20 = arith.addf %18, %19 : vector<2x128xf32>
    %21 = math.log %11 : vector<2x128xf32>
    %22 = arith.subf %20, %21 : vector<2x128xf32>
    %c0_9 = arith.constant 0 : index
    %c0_10 = arith.constant 0 : index
    %23 = vector.load %arg3[%c0_9, %c0_10] : memref<2x128xf32, #tpu.memory_space<vmem>>, vector<2x128xf32>
    %24 = arith.mulf %22, %23 : vector<2x128xf32>
    %c0_11 = arith.constant 0 : index
    %c0_12 = arith.constant 0 : index
    %25 = vector.load %arg4[%c0_11, %c0_12] : memref<2x128xf32, #tpu.memory_space<vmem>>, vector<2x128xf32>
    tpu.vector_store %arg4[%c0_11, %c0_12], %24 {strides = array<i32>} : memref<2x128xf32, #tpu.memory_space<vmem>>, vector<2x128xf32>,
    return
  }
  func.func @transform_0(%arg0: i32) -> (i32, i32, i32) {
    %c0_i32 = arith.constant 0 : i32
    %c0_i32_0 = arith.constant 0 : i32
    %c0_i32_1 = arith.constant 0 : i32
    return %c0_i32, %c0_i32_0, %arg0 : i32, i32, i32
  }
  func.func @transform_1(%arg0: i32) -> (i32, i32, i32) {
    %c0_i32 = arith.constant 0 : i32
    %c0_i32_0 = arith.constant 0 : i32
    %c0_i32_1 = arith.constant 0 : i32
    return %c0_i32, %c0_i32_0, %arg0 : i32, i32, i32
  }
  func.func @transform_2(%arg0: i32) -> (i32, i32) {
    %c0_i32 = arith.constant 0 : i32
    %c0_i32_0 = arith.constant 0 : i32
    return %c0_i32, %arg0 : i32, i32
  }
  func.func @transform_3(%arg0: i32) -> (i32, i32) {
    %c0_i32 = arith.constant 0 : i32
    %c0_i32_0 = arith.constant 0 : i32
    return %c0_i32, %arg0 : i32, i32
  }
}

</mosaic_0001>

<bundles_post_ra>
// kernel: a_call__.1
= control target key start
LH: loop header
LB: loop body
LE: loop exit
PB: predicated region body
PF: predicated region fallthrough
CT: control target
= control target key end

     0   :  { %vm18_vm0 = vcmask 1043456   ;;  %vm131_vm1 = vcmask 1041409   ;;  %s207_s0 = inlined_call_operand.vmem [shape: f32[2,4,128], index: 0, kind: input, shape index: {}]   ;;  %s208_s1 = inlined_call_operand.vmem [shape: f32[2,4,128], index: 1, kind: input, shape index: {}]   ;;  %s209_s2 = inlined_call_operand.vmem [shape: f32[2,128], index: 2, kind: input, shape index: {}]   ;;  %s210_s3 = inlined_call_operand.vmem [shape: f32[2,128], index: 3, kind: output, shape index: {}]  }
   0x1   :  { %v14_v0 = vld [vmem:[%s207_s0] sm:$0xf]  ;;  %v15_v1 = vld [vmem:[%s207_s0 + $0x4] sm:$0xf] }
   0x2   :  { %v16_v2 = vld [vmem:[%s208_s1] sm:$0xf]  ;;  %v17_v3 = vld [vmem:[%s208_s1 + $0x4] sm:$0xf]  ;;  %v19_v4 = vsel %vm18_vm0, %v14_v0, -inf  ;;  %v26_v5 = vsel %vm18_vm0, %v15_v1, -inf }
   0x3   :  { %v35_v6 = vsel %vm18_vm0, %v16_v2, -inf  ;;  %v20_v7 = vrot.slane %v19_v4, 4  ;;  %v27_v8 = vrot.slane %v26_v5, 4  ;;  %v42_v10 = vsel %vm18_vm0, %v17_v3, -inf }
   0x4   :  { %v36_v9 = vrot.slane %v35_v6, 4  ;;  %v43_v11 = vrot.slane %v42_v10, 4 }
   0x5   :  { %v21_v12 = vmax.f32 %v19_v4, %v20_v7  ;;  %v28_v13 = vmax.f32 %v26_v5, %v27_v8 }
   0x6   :  { %v37_v14 = vmax.f32 %v35_v6, %v36_v9  ;;  %v44_v15 = vmax.f32 %v42_v10, %v43_v11 }
   0x7   :  { %v22_v16 = vrot.slane %v21_v12, 2  ;;  %v29_v17 = vrot.slane %v28_v13, 2 }
   0x8   :  { %v38_v18 = vrot.slane %v37_v14, 2  ;;  %v45_v19 = vrot.slane %v44_v15, 2 }
   0x9   :  { %v23_v20 = vmax.f32 %v21_v12, %v22_v16  ;;  %v30_v21 = vmax.f32 %v28_v13, %v29_v17 }
   0xa   :  { %v39_v22 = vmax.f32 %v37_v14, %v38_v18  ;;  %v46_v23 = vmax.f32 %v44_v15, %v45_v19 }
   0xb   :  { %v24_v24 = vrot.slane %v23_v20, 1  ;;  %v31_v25 = vrot.slane %v30_v21, 1 }
   0xc   :  { %v40_v26 = vrot.slane %v39_v22, 1  ;;  %v47_v27 = vrot.slane %v46_v23, 1 }
   0xd   :  { %v25_v28 = vmax.f32 %v23_v20, %v24_v24  ;;  %v32_v29 = vmax.f32 %v30_v21, %v31_v25 }
   0xe   :  { %v41_v30 = vmax.f32 %v39_v22, %v40_v26  ;;  %v48_v31 = vmax.f32 %v46_v23, %v47_v27 }
   0xf   :  { %v33_v32 = vsub.f32 %v14_v0, %v25_v28  ;;  %v34_v33 = vsub.f32 %v15_v1, %v32_v29 }
  0x10   :  { %v49_v34 = vsub.f32 %v16_v2, %v41_v30  ;;  %v50_v35 = vsub.f32 %v17_v3, %v48_v31 }
  0x11   :  { %v51_v36 = vmul.f32 1.442695, %v33_v32  ;;  %v53_v37 = vmul.f32 1.442695, %v34_v33 }
  0x12   :  { %v69_v38 = vmul.f32 1.442695, %v49_v34  ;;  %v71_v39 = vmul.f32 1.442695, %v50_v35  ;;  %v87_v40 = vsub.f32 %v33_v32, %v49_v34  ;;  %v88_v41 = vsub.f32 %v34_v33, %v50_v35  ;;  %v121_v33 = vld [vmem:[%s209_s2] sm:$0x3] }
  0x13   :  { %139 = vpow2.f32 %v51_v36 }
  0x14   :  { %141 = vpow2.f32 %v53_v37 }
  0x15   :  { %143 = vpow2.f32 %v69_v38 }
  0x16   :  { %145 = vpow2.f32 %v71_v39 }
  0x20   :  { %v140_v42 = vpop.eup %139 }
  0x21   :  { %v142_v43 = vpop.eup %141  ;;  %v55_v44 = vsel %vm18_vm0, %v140_v42, 0.0  ;;  %v89_v45 = vmul.f32 %v140_v42, %v87_v40 }
  0x22   :  { %v144_v46 = vpop.eup %143  ;;  %v56_v47 = vrot.slane %v55_v44, 4  ;;  %v62_v48 = vsel %vm18_vm0, %v142_v43, 0.0  ;;  %v90_v49 = vmul.f32 %v142_v43, %v88_v41  ;;  %v123_v41 = vrot.slane %v121_v33, 1 }
  0x23   :  { %v146_v50 = vpop.eup %145  ;;  %v63_v51 = vrot.slane %v62_v48, 4  ;;  %v73_v52 = vsel %vm18_vm0, %v144_v46, 0.0  ;;  %v91_v53 = vsel %vm18_vm0, %v89_v45, 0.0 }
  0x24   :  { %v57_v54 = vadd.f32 %v56_v47, %v55_v44  ;;  %v74_v55 = vrot.slane %v73_v52, 4  ;;  %v80_v56 = vsel %vm18_vm0, %v146_v50, 0.0  ;;  %v92_v57 = vrot.slane %v91_v53, 4 }
  0x25   :  { %v64_v58 = vadd.f32 %v63_v51, %v62_v48  ;;  %v81_v59 = vrot.slane %v80_v56, 4  ;;  %v98_v60 = vsel %vm18_vm0, %v90_v49, 0.0 }
  0x26   :  { %v58_v61 = vrot.slane %v57_v54, 2  ;;  %v75_v62 = vadd.f32 %v74_v55, %v73_v52  ;;  %v99_v63 = vrot.slane %v98_v60, 4  ;;  %v93_v4 = vadd.f32 %v92_v57, %v91_v53 }
  0x27   :  { %v65_v0 = vrot.slane %v64_v58, 2  ;;  %v82_v1 = vadd.f32 %v81_v59, %v80_v56 }
  0x28   :  { %v59_v2 = vadd.f32 %v58_v61, %v57_v54  ;;  %v76_v3 = vrot.slane %v75_v62, 2  ;;  %v100_v7 = vadd.f32 %v99_v63, %v98_v60  ;;  %v94_v14 = vrot.slane %v93_v4, 2 }
  0x29   :  { %v66_v5 = vadd.f32 %v65_v0, %v64_v58  ;;  %v83_v6 = vrot.slane %v82_v1, 2 }
  0x2a   :  { %v60_v8 = vrot.slane %v59_v2, 1  ;;  %v77_v9 = vadd.f32 %v76_v3, %v75_v62  ;;  %v101_v17 = vrot.slane %v100_v7, 2  ;;  %v95_v20 = vadd.f32 %v94_v14, %v93_v4 }
  0x2b   :  { %v67_v10 = vrot.slane %v66_v5, 1  ;;  %v84_v11 = vadd.f32 %v83_v6, %v82_v1 }
  0x2c   :  { %v61_v12 = vadd.f32 %v60_v8, %v59_v2  ;;  %v78_v13 = vrot.slane %v77_v9, 1  ;;  %v102_v21 = vadd.f32 %v101_v17, %v100_v7  ;;  %v96_v22 = vrot.slane %v95_v20, 1 }
  0x2d   :  { %v68_v15 = vadd.f32 %v67_v10, %v66_v5  ;;  %v85_v16 = vrot.slane %v84_v11, 1 }
  0x2e   :  { %v79_v18 = vadd.f32 %v78_v13, %v77_v9  ;;  %147 = vrcp.f32 %v61_v12  ;;  %v103_v23 = vrot.slane %v102_v21, 1  ;;  %v97_v24 = vadd.f32 %v96_v22, %v95_v20 }
  0x2f   :  { %v86_v19 = vadd.f32 %v85_v16, %v84_v11  ;;  %149 = vrcp.f32 %v68_v15 }
  0x30   :  { %151 = vlog2.f32 %v79_v18  ;;  %v104_v25 = vadd.f32 %v103_v23, %v102_v21 }
  0x31   :  { %153 = vlog2.f32 %v86_v19 }
  0x32   :  { %155 = vlog2.f32 %v61_v12 }
  0x33   :  { %157 = vlog2.f32 %v68_v15 }
  0x3b   :  { %v148_v26 = vpop.eup %147 }
  0x3c   :  { %v150_v27 = vpop.eup %149  ;;  %v107_v28 = vmul.f32 %v148_v26, %v97_v24 }
  0x3d   :  { %v152_v29 = vpop.eup %151  ;;  %v108_v30 = vmul.f32 %v150_v27, %v104_v25 }
  0x3e   :  { %v154_v31 = vpop.eup %153  ;;  %v110_v32 = vmul.f32 0.6931472, %v152_v29 }
  0x3f   :  { %v156_v34 = vpop.eup %155  ;;  %v112_v35 = vmul.f32 0.6931472, %v154_v31 }
  0x40   :  { %v158_v36 = vpop.eup %157  ;;  %v113_v37 = vadd.f32 %v110_v32, %v107_v28  ;;  %v116_v38 = vmul.f32 0.6931472, %v156_v34 }
  0x41   :  { %v114_v39 = vadd.f32 %v112_v35, %v108_v30  ;;  %v118_v40 = vmul.f32 0.6931472, %v158_v36 }
  0x42   :  { %v119_v42 = vsub.f32 %v113_v37, %v116_v38 }
  0x43   :  { %v120_v43 = vsub.f32 %v114_v39, %v118_v40 }
  0x44   :  { %v126_v44 = vmul.f32 %v121_v33, %v119_v42 }
  0x45   :  { %v127_v45 = vmul.f32 %v123_v41, %v120_v43 }
  0x47   :  { %v130_v46 = vrot.slane %v127_v45, 7 }
  0x49   :  { %v132_v47 = vsel %vm131_vm1, %v130_v46, %v126_v44 }
  0x4a   :  { %134 = vst [vmem:[%s210_s3] sm:$0x3] %v132_v47 }

</bundles_post_ra>
